<compile_context>
chip_gen: v5e
topology: v5e:2x2
jax: 0.10.0
libtpu: 0.0.40
codegen_flags: <defaults>
</compile_context>

<pallas_src>
import functools

import jax
import jax.numpy as jnp
from jax.experimental import pallas as pl
from jax.experimental.pallas import tpu as pltpu

EPS = 1e-5  # nn.LayerNorm default


def _layernorm_rows_f32(x):
    """Two-pass LayerNorm (no affine) over the last dim, in f32."""
    xf = x.astype(jnp.float32)
    mean = jnp.mean(xf, axis=-1, keepdims=True)
    xc = xf - mean
    var = jnp.mean(xc * xc, axis=-1, keepdims=True)
    return xc * jax.lax.rsqrt(var + EPS)


def prenorm_kernel_fused(x_ref, w_ref, b_ref, o_ref):
    # Single output-column block (W fully resident): normalize + matmul in one go.
    xn = _layernorm_rows_f32(x_ref[...]).astype(w_ref.dtype)
    acc = jnp.dot(xn, w_ref[...], preferred_element_type=jnp.float32)
    o_ref[...] = (acc + b_ref[...]).astype(o_ref.dtype)


def prenorm_kernel_coltiled(x_ref, w_ref, b_ref, o_ref, xn_ref):
    # Multiple output-column blocks: compute LayerNorm once per row tile
    # (j == 0), cache normalized rows in VMEM (w.dtype), reuse for every j.
    @pl.when(pl.program_id(1) == 0)
    def _():
        xn_ref[...] = _layernorm_rows_f32(x_ref[...]).astype(xn_ref.dtype)

    acc = jnp.dot(xn_ref[...], w_ref[...], preferred_element_type=jnp.float32)
    o_ref[...] = (acc + b_ref[...]).astype(o_ref.dtype)


def _round_up(n, m):
    return ((n + m - 1) // m) * m


def _vmem_capacity_bytes():
    try:
        return int(pltpu.get_tpu_info().vmem_capacity_bytes)
    except Exception:
        return 64 << 20  # v7x-conservative fallback


def _pick_tile_n(D, w_itemsize, budget_bytes):
    """Output-column block width.  Prefer a fully-resident W (tile_n = D);
    otherwise the largest 256-multiple (full MXU-N on v6e/v7x) dividing D
    whose double-buffered (D, tile_n) block fits the budget."""
    if 2 * D * D * w_itemsize <= budget_bytes:
        return D
    base = 256 if D % 256 == 0 else 128
    cap_cols = max(base, budget_bytes // max(1, 2 * D * w_itemsize))
    best = base
    t = base
    while t <= min(D, cap_cols):
        if D % t == 0:
            best = t
        t += base
    return best


def _pick_tile_rows(rows, D, tile_n, grid_cols, in_itemsize, out_itemsize,
                    w_itemsize, budget_bytes):
    """Row-tile sized so double-buffered I/O tiles PLUS the f32 in-kernel
    LayerNorm temporaries (and the normalized-x scratch, if any) fit the
    budget.  Large tiles amortize the ~0.35 us per-grid-step overhead."""
    per_row = (2 * D * in_itemsize            # x tile (double-buffered)
               + 2 * tile_n * out_itemsize    # out tile (double-buffered)
               + 3 * D * 4)                   # f32 temporaries (x_f32, xc, xn)
    if grid_cols > 1:
        per_row += D * w_itemsize             # normalized-x VMEM scratch
    if D <= 512:
        hard_cap = 4096
    elif D <= 1024:
        hard_cap = 2048
    elif D <= 2048:
        hard_cap = 1024
    else:
        hard_cap = 512
    cand = max(8, min(hard_cap, budget_bytes // max(1, per_row)))
    if cand >= 256:
        cand = (cand // 256) * 256
    elif cand >= 128:
        cand = (cand // 128) * 128
    else:
        cand = (cand // 8) * 8
    return max(8, min(cand, _round_up(rows, 8)))


@functools.partial(jax.jit, static_argnames=("tile_rows", "tile_n"))
def prenorm(x, gamma, beta, w, b, *, tile_rows=None, tile_n=None):
    """PreNorm forward: fn(LayerNorm(x)), fn = Linear(dim, dim).
    x: (batch, seq, dim) -> (batch, seq, dim).  Requires dim % 128 == 0."""
    B, S, D = x.shape
    assert D % 128 == 0, "PreNorm Pallas kernel requires dim to be a multiple of 128"
    rows = B * S
    x2 = x.reshape(rows, D)
    out_dtype = x.dtype

    # Fold the LayerNorm affine into the linear layer once, outside the grid:
    #   (xn*gamma + beta) @ W + b  ==  xn @ (gamma[:,None]*W) + (beta @ W + b)
    w_f32 = w.astype(jnp.float32)
    w_eff = (gamma.astype(jnp.float32)[:, None] * w_f32).astype(w.dtype)
    b_eff = (beta.astype(jnp.float32) @ w_f32
             + b.astype(jnp.float32)).reshape(1, D)       # stays f32 (post-MXU add)

    # Generation-aware budgets (v5e/v6e: 128 MiB VMEM, v7x: 64 MiB).
    vmem_cap = _vmem_capacity_bytes()
    total_budget = int(0.65 * vmem_cap)

    if tile_n is None:
        tile_n = _pick_tile_n(D, w.dtype.itemsize, total_budget // 2)
    assert D % tile_n == 0
    grid_cols = D // tile_n

    w_block_bytes = 2 * D * tile_n * w.dtype.itemsize + 2 * tile_n * 4
    if tile_rows is None:
        tile_rows = _pick_tile_rows(
            rows, D, tile_n, grid_cols, x.dtype.itemsize, out_dtype.itemsize,
            w.dtype.itemsize, max(1 << 20, total_budget - w_block_bytes))
    grid_rows = pl.cdiv(rows, tile_rows)   # no padding: edge blocks handled by Pallas

    # Honest VMEM footprint -> explicit limit, capped at 75% of physical VMEM
    # so Mosaic internal scratch and full double-buffering keep headroom.
    est = (2 * tile_rows * D * x.dtype.itemsize
           + 2 * tile_rows * tile_n * out_dtype.itemsize
           + 3 * tile_rows * D * 4
           + w_block_bytes)
    if grid_cols > 1:
        est += tile_rows * D * w.dtype.itemsize
    vmem_limit = int(min(int(0.75 * vmem_cap), max(32 << 20, est + (8 << 20))))

    out_shape = jax.ShapeDtypeStruct((rows, D), out_dtype)

    if grid_cols == 1:
        out = pl.pallas_call(
            prenorm_kernel_fused,
            out_shape=out_shape,
            grid_spec=pltpu.PrefetchScalarGridSpec(
                num_scalar_prefetch=0,
                grid=(grid_rows,),
                in_specs=[
                    pl.BlockSpec((tile_rows, D), lambda i: (i, 0)),   # x rows
                    pl.BlockSpec((D, D), lambda i: (0, 0)),           # W (resident)
                    pl.BlockSpec((1, D), lambda i: (0, 0)),           # bias (f32)
                ],
                out_specs=pl.BlockSpec((tile_rows, D), lambda i: (i, 0)),
            ),
            compiler_params=pltpu.CompilerParams(
                dimension_semantics=("parallel",),
                vmem_limit_bytes=vmem_limit),
        )(x2, w_eff, b_eff)
    else:
        out = pl.pallas_call(
            prenorm_kernel_coltiled,
            out_shape=out_shape,
            grid_spec=pltpu.PrefetchScalarGridSpec(
                num_scalar_prefetch=0,
                grid=(grid_rows, grid_cols),
                in_specs=[
                    pl.BlockSpec((tile_rows, D), lambda i, j: (i, 0)),  # x rows (not re-fetched across j)
                    pl.BlockSpec((D, tile_n), lambda i, j: (0, j)),     # W column block
                    pl.BlockSpec((1, tile_n), lambda i, j: (0, j)),     # bias (f32)
                ],
                out_specs=pl.BlockSpec((tile_rows, tile_n), lambda i, j: (i, j)),
                scratch_shapes=[pltpu.VMEM((tile_rows, D), w.dtype)],   # cached normalized x
            ),
            compiler_params=pltpu.CompilerParams(
                # Row tiles shard across cores; j carries the scratch -> arbitrary.
                dimension_semantics=("parallel", "arbitrary"),
                vmem_limit_bytes=vmem_limit),
        )(x2, w_eff, b_eff)

    return out.reshape(B, S, D)


def prenorm_ref(x, gamma, beta, w, b):
    """Pure-JAX f32 reference: LayerNorm(x) @ W + b."""
    xf = x.astype(jnp.float32)
    mean = jnp.mean(xf, axis=-1, keepdims=True)
    var = jnp.mean((xf - mean) ** 2, axis=-1, keepdims=True)
    y = (xf - mean) * jax.lax.rsqrt(var + EPS) * gamma.astype(jnp.float32) \
        + beta.astype(jnp.float32)
    return y @ w.astype(jnp.float32) + b.astype(jnp.float32)


if __name__ == "__main__":
    # TODO(synk): `fn` is an arbitrary module in PyTorch; instantiated here as
    # Linear(dim, dim) with deterministic synthetic parameters.
    key = jax.random.PRNGKey(0)

    # ---- Test 1: small (batch, seq, dim) stream, D=128 -> fused (resident-W) kernel.
    B, S, D = 2, 8, 128
    kx, kg, kb2, kw, kb = jax.random.split(key, 5)
    x = jax.random.normal(kx, (B, S, D), dtype=jnp.float32).astype(jnp.bfloat16)
    gamma = (1.0 + 0.1 * jax.random.normal(kg, (D,), dtype=jnp.float32))
    beta = (0.05 * jax.random.normal(kb2, (D,), dtype=jnp.float32))
    w = (jax.random.normal(kw, (D, D), dtype=jnp.float32) * 0.02).astype(jnp.bfloat16)
    b = (jax.random.normal(kb, (D,), dtype=jnp.float32) * 0.02).astype(jnp.bfloat16)

    out = jax.block_until_ready(prenorm(x, gamma, beta, w, b))
    ref = prenorm_ref(x, gamma, beta, w, b)
    assert out.shape == (B, S, D)
    err = jnp.max(jnp.abs(out.astype(jnp.float32) - ref))
    assert err < 2e-2, f"test1 max abs err {err}"

    # ---- Test 2: ragged rows + forced column tiling -> col-tiled kernel with
    # the normalized-x scratch and Pallas edge-block handling (no padding).
    B2, S2, D2 = 2, 9, 256
    kx2, kg2, kb22, kw2, kbb2 = jax.random.split(jax.random.PRNGKey(1), 5)
    x2 = jax.random.normal(kx2, (B2, S2, D2), dtype=jnp.float32).astype(jnp.bfloat16)
    gamma2 = (1.0 + 0.1 * jax.random.normal(kg2, (D2,), dtype=jnp.float32))
    beta2 = (0.05 * jax.random.normal(kb22, (D2,), dtype=jnp.float32))
    w2 = (jax.random.normal(kw2, (D2, D2), dtype=jnp.float32) * 0.02).astype(jnp.bfloat16)
    b2 = (jax.random.normal(kbb2, (D2,), dtype=jnp.float32) * 0.02).astype(jnp.bfloat16)

    out2 = jax.block_until_ready(prenorm(x2, gamma2, beta2, w2, b2, tile_n=128))
    ref2 = prenorm_ref(x2, gamma2, beta2, w2, b2)
    assert out2.shape == (B2, S2, D2)
    err2 = jnp.max(jnp.abs(out2.astype(jnp.float32) - ref2))
    assert err2 < 2e-2, f"test2 max abs err {err2}"

    print("KERNEL_OK")
</pallas_src>

<mosaic_0001>
module attributes {stable_mosaic.version = 11 : i64} {
  func.func @prenorm_kernel_fused(%arg0: i32, %arg1: memref<16x128xbf16, #tpu.memory_space<vmem>>, %arg2: memref<128x128xbf16, #tpu.memory_space<vmem>>, %arg3: memref<1x128xf32, #tpu.memory_space<vmem>>, %arg4: memref<16x128xbf16, #tpu.memory_space<vmem>>) attributes {dimension_semantics = [#tpu.dimension_semantics<parallel>], iteration_bounds = array<i64: 1>, scalar_prefetch = 0 : i64, scratch_operands = 0 : i64, tpu.core_type = #tpu.core_type<tc>, window_params = [{transform_indices = @transform_0, window_bounds = array<i64: 16, 128>}, {pipeline_mode = #tpu.pipeline_mode<synchronous>, transform_indices = @transform_1, window_bounds = array<i64: 128, 128>}, {pipeline_mode = #tpu.pipeline_mode<synchronous>, transform_indices = @transform_2, window_bounds = array<i64: 1, 128>}, {transform_indices = @transform_3, window_bounds = array<i64: 16, 128>}]} {
    %c0 = arith.constant 0 : index
    %c0_0 = arith.constant 0 : index
    %0 = vector.load %arg1[%c0, %c0_0] : memref<16x128xbf16, #tpu.memory_space<vmem>>, vector<16x128xbf16>
    %1 = arith.extf %0 : vector<16x128xbf16> to vector<16x128xf32>
    %cst = arith.constant dense<0.000000e+00> : vector<16xf32>
    %2 = vector.multi_reduction <add>, %1, %cst [1] : vector<16x128xf32> to vector<16xf32>
    %3 = vector.shape_cast %2 : vector<16xf32> to vector<16x1xf32>
    %cst_1 = arith.constant 1.280000e+02 : f32
    %4 = vector.broadcast %cst_1 : f32 to vector<16x1xf32>
    %5 = arith.divf %3, %4 : vector<16x1xf32>
    %6 = vector.broadcast %5 : vector<16x1xf32> to vector<16x128xf32>
    %7 = arith.subf %1, %6 : vector<16x128xf32>
    %8 = arith.mulf %7, %7 : vector<16x128xf32>
    %cst_2 = arith.constant dense<0.000000e+00> : vector<16xf32>
    %9 = vector.multi_reduction <add>, %8, %cst_2 [1] : vector<16x128xf32> to vector<16xf32>
    %10 = vector.shape_cast %9 : vector<16xf32> to vector<16x1xf32>
    %cst_3 = arith.constant 1.280000e+02 : f32
    %11 = vector.broadcast %cst_3 : f32 to vector<16x1xf32>
    %12 = arith.divf %10, %11 : vector<16x1xf32>
    %cst_4 = arith.constant 9.99999974E-6 : f32
    %13 = vector.broadcast %cst_4 : f32 to vector<16x1xf32>
    %14 = arith.addf %12, %13 : vector<16x1xf32>
    %15 = math.rsqrt %14 : vector<16x1xf32>
    %16 = vector.broadcast %15 : vector<16x1xf32> to vector<16x128xf32>
    %17 = arith.mulf %7, %16 : vector<16x128xf32>
    %18 = arith.truncf %17 : vector<16x128xf32> to vector<16x128xbf16>
    %c0_5 = arith.constant 0 : index
    %c0_6 = arith.constant 0 : index
    %19 = vector.load %arg2[%c0_5, %c0_6] : memref<128x128xbf16, #tpu.memory_space<vmem>>, vector<128x128xbf16>
    %cst_7 = arith.constant dense<0.000000e+00> : vector<16x128xf32>
    %20 = tpu.matmul %18, %19, %cst_7 {dimension_numbers = #tpu.dot_dimension_numbers<[1], [0], [0], [1], [0, 0, 1, 1], [], []>} : vector<16x128xbf16>, vector<128x128xbf16>, vector<16x128xf32> -> vector<16x128xf32>
    %c0_8 = arith.constant 0 : index
    %c0_9 = arith.constant 0 : index
    %21 = vector.load %arg3[%c0_8, %c0_9] : memref<1x128xf32, #tpu.memory_space<vmem>>, vector<1x128xf32>
    %22 = vector.broadcast %21 : vector<1x128xf32> to vector<16x128xf32>
    %23 = arith.addf %20, %22 : vector<16x128xf32>
    %24 = arith.truncf %23 : vector<16x128xf32> to vector<16x128xbf16>
    %c0_10 = arith.constant 0 : index
    %c0_11 = arith.constant 0 : index
    %25 = vector.load %arg4[%c0_10, %c0_11] : memref<16x128xbf16, #tpu.memory_space<vmem>>, vector<16x128xbf16>
    tpu.vector_store %arg4[%c0_10, %c0_11], %24 {strides = array<i32>} : memref<16x128xbf16, #tpu.memory_space<vmem>>, vector<16x128xbf16>,
    return
  }
  func.func @transform_0(%arg0: i32) -> (i32, i32) {
    %c0_i32 = arith.constant 0 : i32
    %c0_i32_0 = arith.constant 0 : i32
    return %arg0, %c0_i32 : i32, i32
  }
  func.func @transform_1(%arg0: i32) -> (i32, i32) {
    %c0_i32 = arith.constant 0 : i32
    %c0_i32_0 = arith.constant 0 : i32
    %c0_i32_1 = arith.constant 0 : i32
    return %c0_i32, %c0_i32_0 : i32, i32
  }
  func.func @transform_2(%arg0: i32) -> (i32, i32) {
    %c0_i32 = arith.constant 0 : i32
    %c0_i32_0 = arith.constant 0 : i32
    %c0_i32_1 = arith.constant 0 : i32
    return %c0_i32, %c0_i32_0 : i32, i32
  }
  func.func @transform_3(%arg0: i32) -> (i32, i32) {
    %c0_i32 = arith.constant 0 : i32
    %c0_i32_0 = arith.constant 0 : i32
    return %arg0, %c0_i32 : i32, i32
  }
}

</mosaic_0001>

<bundles_post_ra>
// kernel: prenorm.1
= control target key start
LH: loop header
LB: loop body
LE: loop exit
PB: predicated region body
PF: predicated region fallthrough
CT: control target
= control target key end

     0   :  { %s314_s0 = inlined_call_operand.vmem [shape: bf16[16,128], index: 0, kind: input, shape index: {}]   ;;  %s315_s1 = inlined_call_operand.vmem [shape: bf16[128,128], index: 1, kind: input, shape index: {}]   ;;  %s316_s2 = inlined_call_operand.vmem [shape: f32[1,128], index: 2, kind: input, shape index: {}]   ;;  %s317_s3 = inlined_call_operand.hbm [shape: bf16[16,128], index: 3, kind: output, shape index: {}]  }
   0x1   :  { %v212_v0 = vld [vmem:[%s314_s0] sm:$0xff]  }
   0x2   :  { %8 = vsyncpa [#allocation3], 0  ;;  %v213_v1 = vunpack.c.l.bf16 %v212_v0  ;;  %v214_v2 = vunpack.c.h.bf16 %v212_v0  ;;  %v257_v3 = vmov 128.0   ;;  %v210_v18 = vld [vmem:[%s315_s1 + $0x38] sm:$0xff]  ;;  %v209_v19 = vld [vmem:[%s315_s1 + $0x30] sm:$0xff]  ;;  %s258_s30 = smov [#allocation2]  }
   0x3   :  { %225 = vrcp.f32 %v257_v3  ;;  %135 = vmatpush.bf16.msra.mxu0 %v210_v18  ;;  %v208_v20 = vld [vmem:[%s315_s1 + $0x28] sm:$0xff]  ;;  %v207_v21 = vld [vmem:[%s315_s1 + $0x20] sm:$0xff]  ;;  %v206_v22 = vld [vmem:[%s315_s1 + $0x18] sm:$0xff]  ;;  %s157_s4 = sshll.u32 %s258_s30, 4  ;;  %s159_s7 = sshll.u32 %s317_s3, 4  ;;  %s158_s4 = int_to_ptr.vmem [resolvable:$true] %s157_s4  ;;  %s160_s7 = int_to_ptr.hbm [resolvable:$true] %s159_s7 }
   0x4   :  { %19 = vadd.xlane.f32.xlu0 %v213_v1  ;;  %v205_v23 = vld [vmem:[%s315_s1 + $0x10] sm:$0xff]  ;;  %v204_v24 = vld [vmem:[%s315_s1 + $0x8] sm:$0xff]  ;;  %v203_v25 = vld [vmem:[%s315_s1] sm:$0xff]  ;;  %s259_s8 = smov 64   ;;  %s260_s9 = smov 4  }
   0x5   :  { %v224_v50 = vld [vmem:[%s316_s2] ss:$0 sm:$0xff] }
   0x7   :  { %136 = vmatpush.bf16.msra.mxu0 %v209_v19 }
   0x9   :  { %v226_v4 = vpop.eup %225 }
   0xa   :  { %v24_v5 = vmul.f32 128.0, %v226_v4  ;;  %vm28_vm0 = vweird.f32 %v226_v4 }
   0xb   :  { %137 = vmatpush.bf16.msra.mxu0 %v208_v20 }
   0xc   :  { %21 = vadd.xlane.f32.xlu0 %v214_v2  ;;  %v25_v6 = vsub.f32 1.0, %v24_v5 }
   0xe   :  { %v26_v7 = vmul.f32 %v226_v4, %v25_v6 }
   0xf   :  { %138 = vmatpush.bf16.msra.mxu0 %v207_v21 }
  0x10   :  { %v27_v8 = vadd.f32 %v226_v4, %v26_v7 }
  0x12   :  { %v29_v9 = vsel %vm28_vm0, %v226_v4, %v27_v8 }
  0x13   :  { %139 = vmatpush.bf16.msra.mxu0 %v206_v22 }
  0x17   :  { %140 = vmatpush.bf16.msra.mxu0 %v205_v23 }
  0x1b   :  { %141 = vmatpush.bf16.msra.mxu0 %v204_v24 }
  0x1f   :  { %142 = vmatpush.bf16.msra.mxu0 %v203_v25 }
  0x77   :  { %v20_v10 = vpop.xlane.xlu0 %19 }
  0x78   :  { %v30_v11 = vmul.f32 %v29_v9, %v20_v10 }
  0x7a   :  { %v32_v12 = vsub.f32 %v213_v1, %v30_v11 }
  0x7c   :  { %v34_v13 = vmul.f32 %v32_v12, %v32_v12 }
  0x7e   :  { %36 = vadd.xlane.f32.xlu1 %v34_v13 }
  0x7f   :  { %v22_v14 = vpop.xlane.xlu0 %21 }
  0x80   :  { %v31_v15 = vmul.f32 %v29_v9, %v22_v14 }
  0x82   :  { %v33_v16 = vsub.f32 %v214_v2, %v31_v15 }
  0x84   :  { %v35_v17 = vmul.f32 %v33_v16, %v33_v16 }
  0x86   :  { %38 = vadd.xlane.f32.xlu1 %v35_v17 }
  0xf1   :  { %v37_v26 = vpop.xlane.xlu1 %36 }
  0xf2   :  { %v40_v27 = vmul.f32 %v37_v26, %v29_v9 }
  0xf4   :  { %v42_v28 = vadd.f32 1e-05, %v40_v27 }
  0xf6   :  { %227 = vrsqrt.f32 %v42_v28  ;;  %vm50_vm2 = vweird.f32 %v42_v28 }
  0xf9   :  { %v39_v29 = vpop.xlane.xlu1 %38 }
  0xfa   :  { %v41_v30 = vmul.f32 %v39_v29, %v29_v9 }
  0xfc   :  { %v228_v31 = vpop.eup %227  ;;  %v43_v32 = vadd.f32 1e-05, %v41_v30 }
  0xfd   :  { %v45_v33 = vmul.f32 %v228_v31, %v42_v28  ;;  %vm51_vm1 = vweird.f32 %v228_v31 }
  0xfe   :  { %229 = vrsqrt.f32 %v43_v32  ;;  %vm52_vm4 = vmor %vm50_vm2, %vm51_vm1  ;;  %vm60_vm5 = vweird.f32 %v43_v32 }
  0xff   :  { %v46_v34 = vmul.f32 %v228_v31, %v45_v33 }
 0x101   :  { %v47_v35 = vmul.f32 0.5, %v46_v34 }
 0x103   :  { %v48_v37 = vsub.f32 1.5, %v47_v35 }
 0x104   :  { %v230_v36 = vpop.eup %229 }
 0x105   :  { %v55_v38 = vmul.f32 %v230_v36, %v43_v32  ;;  %v49_v41 = vmul.f32 %v228_v31, %v48_v37  ;;  %vm61_vm3 = vweird.f32 %v230_v36 }
 0x106   :  { %vm62_vm6 = vmor %vm60_vm5, %vm61_vm3 }
 0x107   :  { %v56_v39 = vmul.f32 %v230_v36, %v55_v38  ;;  %v53_v43 = vsel %vm52_vm4, %v228_v31, %v49_v41 }
 0x108   :  { %v64_v46 = vmul.f32 %v53_v43, %v32_v12 }
 0x109   :  { %v57_v40 = vmul.f32 0.5, %v56_v39 }
 0x10b   :  { %v58_v42 = vsub.f32 1.5, %v57_v40 }
 0x10d   :  { %v59_v44 = vmul.f32 %v230_v36, %v58_v42 }
 0x10f   :  { %v63_v45 = vsel %vm62_vm6, %v230_v36, %v59_v44 }
 0x110   :  { %v65_v47 = vmul.f32 %v63_v45, %v33_v16 }
 0x112   :  { %v66_v48 = vpack.c.bf16 %v65_v47, %v64_v46 }
 0x114   :  { %143 = vmatmul.bf16.vlgmr.msra.gmra.mxu0 %v66_v48 }
 0x191   :  { %v144_v49 = vpop.f32.mrf.mxu0 }
 0x192   :  { %v145_v52 = vadd.f32 %v224_v50, %v144_v49 }
 0x199   :  { %v146_v51 = vpop.f32.mrf.mxu0 }
 0x19a   :  { %v147_v53 = vadd.f32 %v224_v50, %v146_v51 }
 0x19c   :  { %v218_v54 = vpack.c.bf16 %v147_v53, %v145_v52 }
 0x19e   :  { %219 = vst [vmem:[#allocation2] sm:$0xff] %v218_v54  }
 0x19f   :  { %165 = dma.vmem_to_hbm [thread:$0]  %s158_s4, 128, %s160_s7, [#allocation3], %s259_s8, %s259_s8, %s260_s9  }
 0x1a0   :  { %255 = dma.done.wait [#allocation3], 128  }
 0x1a1   :  { %256 = vsyncadd [#allocation3], 4294967168 }
 0x1a2   :  { %170 = vsyncpa [#allocation3], 1 }

</bundles_post_ra>
